<compile_context>
chip_gen: v7x
topology: tpu7x:2x2x1
jax: 0.10.0
libtpu: 0.0.40
codegen_flags: <defaults>
</compile_context>

<pallas_src>
import jax
import jax.numpy as jnp
from jax.experimental import pallas as pl
from jax.experimental.pallas import tpu as pltpu


def mlp_kernel(x_ref, w1_ref, b1_ref, w2_ref, b2_ref, h_ref, pred_ref, acc_ref):
    """One (batch-tile i, hidden-tile j) step: layer-1 tile + layer-2 partial sum."""
    j = pl.program_id(1)

    # ---- layer 1: Linear(input_dim -> hidden_dim) + ReLU -------------------
    # x / w1 arrive in bf16 (cast once outside the kernel); MXU accumulates in f32.
    h = jnp.dot(x_ref[...], w1_ref[...], preferred_element_type=jnp.float32)  # (tm, tn)
    h = jnp.maximum(h + b1_ref[...], 0.0)                                     # bias + ReLU epilogue
    h_ref[...] = h.astype(h_ref.dtype)

    # ---- layer 2: Linear(hidden_dim -> 1), accumulated over hidden tiles ----
    @pl.when(j == 0)
    def _init():
        acc_ref[...] = jnp.zeros_like(acc_ref)

    # (1, tn) x (tm, tn)^T -> (1, tm) on the MXU; batch ends up on the lane axis,
    # making the final pred store lane-dense (no masked vst.msk partial stores).
    acc_ref[...] += jax.lax.dot_general(
        w2_ref[...], h, (((1,), (1,)), ((), ())),
        preferred_element_type=jnp.float32)

    @pl.when(j == pl.num_programs(1) - 1)
    def _finalize():
        p = jnp.maximum(acc_ref[...] + b2_ref[0, 0], 0.0)   # scalar bias from SMEM + ReLU
        pred_ref[...] = p.astype(pred_ref.dtype)


def _default_vmem_limit_bytes():
    # Generation-aware scoped-VMEM budget: ~3/4 of physical VMEM
    # (128 MiB on v5e/v6e -> 96 MiB; 64 MiB per-TC on v7x -> 48 MiB).
    try:
        cap = pltpu.get_tpu_info().vmem_capacity_bytes
    except Exception:
        cap = 64 * 1024 * 1024   # assume the tightest budget (v7x per-TC VMEM)
    return int(cap * 3 // 4)


def mlp_forward(x, w1, b1, w2_row, b2, *, tm=None, tn=None,
                hidden_dtype=jnp.float32, core_parallel_batch=False,
                vmem_limit_bytes=None):
    """Pallas equivalent of MLP.forward.

    Args:
      x:       (B, D)  input features (f32 or bf16).
      w1:      (D, H)  linear1.weight transposed.
      b1:      (1, H)  linear1.bias.
      w2_row:  (1, H)  linear2.weight in native PyTorch layout.
      b2:      (1, 1)  linear2.bias (lives in SMEM).
    Returns (x, output_layer_one, pred), matching the PyTorch module.
    """
    B, D = x.shape
    Dw, H = w1.shape
    assert Dw == D, "w1 must be linear1.weight transposed: (input_dim, hidden_dim)"

    if tm is None:
        # Batch tile: bigger amortizes the ~0.35us per-grid-step overhead. Sweep up to
        # 512-1024 on v5e/v6e (128 MiB VMEM); keep ~256-512 on v7x (64 MiB per TC).
        tm = min(B, 512)
    if tn is None:
        # Hidden tile: multiple of 128 lanes; keeps w1 pipelined instead of requiring
        # the full (D, H) weight to be VMEM-resident.
        tn = min(H, 512)
    # TODO(synk): pad/mask ragged batch & hidden sizes instead of asserting.
    assert B % tm == 0, "batch must be divisible by the batch tile tm"
    assert H % tn == 0, "hidden_dim must be divisible by the hidden tile tn"

    # Cast layer-1 MXU operands to bf16 ONCE here (ideally the producer already
    # supplies bf16 so even this single pass disappears upstream).
    x_bf = x if x.dtype == jnp.bfloat16 else x.astype(jnp.bfloat16)
    w1_bf = w1 if w1.dtype == jnp.bfloat16 else w1.astype(jnp.bfloat16)
    b1_f32 = jnp.asarray(b1, jnp.float32).reshape(1, H)
    w2_f32 = jnp.asarray(w2_row, jnp.float32).reshape(1, H)
    b2_f32 = jnp.asarray(b2, jnp.float32).reshape(1, 1)

    grid = (B // tm, H // tn)

    if core_parallel_batch:
        # v7x: force the batch axis to split across the chip's 2 TensorCores.
        dim_sem = (pltpu.CORE_PARALLEL, pltpu.ARBITRARY)
    else:
        dim_sem = ("parallel", "arbitrary")

    if vmem_limit_bytes is None:
        vmem_limit_bytes = _default_vmem_limit_bytes()

    h_out, pred_slab = pl.pallas_call(
        mlp_kernel,
        out_shape=(
            jax.ShapeDtypeStruct((B, H), hidden_dtype),   # output_layer_one
            jax.ShapeDtypeStruct((1, B), jnp.float32),    # pred, lane-dense slab
        ),
        grid=grid,
        in_specs=[
            pl.BlockSpec((tm, D), lambda i, j: (i, 0)),          # x: batch-tiled, reused over j
            pl.BlockSpec((D, tn), lambda i, j: (0, j)),          # w1: hidden-tiled, pipelined
            pl.BlockSpec((1, tn), lambda i, j: (0, j)),          # b1: hidden-tiled
            pl.BlockSpec((1, tn), lambda i, j: (0, j)),          # w2 row: hidden-tiled
            pl.BlockSpec(memory_space=pltpu.MemorySpace.SMEM),   # b2: scalar in SMEM
        ],
        out_specs=(
            pl.BlockSpec((tm, tn), lambda i, j: (i, j)),         # h: lane-dense (tn % 128 == 0)
            pl.BlockSpec((1, tm), lambda i, j: (0, i)),          # pred: batch on the lane axis
        ),
        scratch_shapes=[pltpu.VMEM((1, tm), jnp.float32)],       # layer-2 accumulator
        compiler_params=pltpu.CompilerParams(
            dimension_semantics=dim_sem,
            vmem_limit_bytes=vmem_limit_bytes,
        ),
    )(x_bf, w1_bf, b1_f32, w2_f32, b2_f32)

    pred = pred_slab.reshape(B, 1)
    # Match the PyTorch forward's return signature: (features, hidden, pred).
    return x, h_out, pred


if __name__ == "__main__":
    # Small but hardware-aligned shapes (lanes = 128): lane-dense h and pred stores,
    # no wasted MXU columns. Grid is (2, 2) so both axes (batch tiles + hidden-tile
    # accumulation) are exercised.
    batch, input_dim, hidden_dim = 256, 128, 256
    tm, tn = 128, 128

    # Deterministic parameters matching the PyTorch __init__ (everything = 1.0).
    w1 = jnp.ones((input_dim, hidden_dim), dtype=jnp.float32)   # linear1.weight.T
    b1 = jnp.ones((1, hidden_dim), dtype=jnp.float32)           # linear1.bias
    w2 = jnp.ones((1, hidden_dim), dtype=jnp.float32)           # linear2.weight (1, H)
    b2 = jnp.ones((1, 1), dtype=jnp.float32)                    # linear2.bias

    x = jax.random.normal(jax.random.PRNGKey(0), (batch, input_dim), dtype=jnp.float32)

    x_out, h_out, pred = mlp_forward(x, w1, b1, w2, b2, tm=tm, tn=tn)
    jax.block_until_ready((x_out, h_out, pred))

    assert x_out.shape == (batch, input_dim)
    assert h_out.shape == (batch, hidden_dim)
    assert pred.shape == (batch, 1)

    # Layer-1 reference with the same bf16 rounding applied to the MXU inputs.
    xb = x.astype(jnp.bfloat16).astype(jnp.float32)
    w1b = w1.astype(jnp.bfloat16).astype(jnp.float32)
    h_ref = jnp.maximum(jnp.matmul(xb, w1b, precision="highest") + b1, 0.0)

    assert jnp.allclose(x_out, x)
    assert jnp.allclose(h_out.astype(jnp.float32), h_ref, atol=2e-2, rtol=1e-3)

    # Layer-2 check on the kernel's own hidden activations (isolates layer 2 from
    # bf16 layer-1 rounding near the ReLU kink).
    pred_ref = jnp.maximum(
        jnp.matmul(h_out.astype(jnp.float32), w2.T, precision="highest") + b2, 0.0)
    assert jnp.allclose(pred, pred_ref, atol=0.25, rtol=1e-3)

    # Loose sanity check of the hidden layer against pure-f32 math (bf16 MXU inputs
    # introduce ~1e-3 relative rounding on x).
    h_f32 = jnp.maximum(jnp.matmul(x, w1, precision="highest") + b1, 0.0)
    assert jnp.allclose(h_out.astype(jnp.float32), h_f32, atol=0.25, rtol=2e-2)

    print("KERNEL_OK")
</pallas_src>

<mosaic_0001>
module attributes {stable_mosaic.version = 11 : i64} {
  func.func @mlp_kernel(%arg0: i32, %arg1: i32, %arg2: memref<128x128xbf16, #tpu.memory_space<vmem>>, %arg3: memref<128x128xbf16, #tpu.memory_space<vmem>>, %arg4: memref<1x128xf32, #tpu.memory_space<vmem>>, %arg5: memref<1x128xf32, #tpu.memory_space<vmem>>, %arg6: memref<1x1xf32, #tpu.memory_space<smem>>, %arg7: memref<128x128xf32, #tpu.memory_space<vmem>>, %arg8: memref<1x128xf32, #tpu.memory_space<vmem>>, %arg9: memref<1x128xf32, #tpu.memory_space<vmem>>) attributes {dimension_semantics = [#tpu.dimension_semantics<parallel>, #tpu.dimension_semantics<arbitrary>], iteration_bounds = array<i64: 2, 2>, scalar_prefetch = 0 : i64, scratch_operands = 1 : i64, tpu.core_type = #tpu.core_type<tc>, window_params = [{transform_indices = @transform_0, window_bounds = array<i64: 128, 128>}, {transform_indices = @transform_1, window_bounds = array<i64: 128, 128>}, {transform_indices = @transform_2, window_bounds = array<i64: 1, 128>}, {transform_indices = @transform_3, window_bounds = array<i64: 1, 128>}, {transform_indices = @transform_4, window_bounds = array<i64: 1, 1>}, {transform_indices = @transform_5, window_bounds = array<i64: 128, 128>}, {transform_indices = @transform_6, window_bounds = array<i64: 1, 128>}]} {
    %c0 = arith.constant 0 : index
    %c0_0 = arith.constant 0 : index
    %0 = vector.load %arg2[%c0, %c0_0] : memref<128x128xbf16, #tpu.memory_space<vmem>>, vector<128x128xbf16>
    %c0_1 = arith.constant 0 : index
    %c0_2 = arith.constant 0 : index
    %1 = vector.load %arg3[%c0_1, %c0_2] : memref<128x128xbf16, #tpu.memory_space<vmem>>, vector<128x128xbf16>
    %cst = arith.constant dense<0.000000e+00> : vector<128x128xf32>
    %2 = tpu.matmul %0, %1, %cst {dimension_numbers = #tpu.dot_dimension_numbers<[1], [0], [0], [1], [0, 0, 1, 1], [], []>} : vector<128x128xbf16>, vector<128x128xbf16>, vector<128x128xf32> -> vector<128x128xf32>
    %c0_3 = arith.constant 0 : index
    %c0_4 = arith.constant 0 : index
    %3 = vector.load %arg4[%c0_3, %c0_4] : memref<1x128xf32, #tpu.memory_space<vmem>>, vector<1x128xf32>
    %4 = vector.broadcast %3 : vector<1x128xf32> to vector<128x128xf32>
    %5 = arith.addf %2, %4 : vector<128x128xf32>
    %cst_5 = arith.constant 0.000000e+00 : f32
    %6 = vector.broadcast %cst_5 : f32 to vector<128x128xf32>
    %7 = arith.maximumf %5, %6 : vector<128x128xf32>
    %c0_6 = arith.constant 0 : index
    %c0_7 = arith.constant 0 : index
    %8 = vector.load %arg7[%c0_6, %c0_7] : memref<128x128xf32, #tpu.memory_space<vmem>>, vector<128x128xf32>
    tpu.vector_store %arg7[%c0_6, %c0_7], %7 {strides = array<i32>} : memref<128x128xf32, #tpu.memory_space<vmem>>, vector<128x128xf32>,
    %c0_i32 = arith.constant 0 : i32
    %9 = arith.cmpi eq, %arg1, %c0_i32 : i32
    %10 = arith.extui %9 : i1 to i32
    %c0_i32_8 = arith.constant 0 : i32
    %11 = arith.cmpi ne, %10, %c0_i32_8 : i32
    scf.if %11 {
      %cst_17 = arith.constant 0.000000e+00 : f32
      %20 = vector.broadcast %cst_17 : f32 to vector<1x128xf32>
      %c0_18 = arith.constant 0 : index
      %c0_19 = arith.constant 0 : index
      %21 = vector.load %arg9[%c0_18, %c0_19] : memref<1x128xf32, #tpu.memory_space<vmem>>, vector<1x128xf32>
      tpu.vector_store %arg9[%c0_18, %c0_19], %20 {strides = array<i32>} : memref<1x128xf32, #tpu.memory_space<vmem>>, vector<1x128xf32>,
    } else {
    }
    %c0_9 = arith.constant 0 : index
    %c0_10 = arith.constant 0 : index
    %12 = vector.load %arg9[%c0_9, %c0_10] : memref<1x128xf32, #tpu.memory_space<vmem>>, vector<1x128xf32>
    %c0_11 = arith.constant 0 : index
    %c0_12 = arith.constant 0 : index
    %13 = vector.load %arg5[%c0_11, %c0_12] : memref<1x128xf32, #tpu.memory_space<vmem>>, vector<1x128xf32>
    %cst_13 = arith.constant dense<0.000000e+00> : vector<1x128xf32>
    %14 = tpu.matmul %13, %7, %cst_13 {dimension_numbers = #tpu.dot_dimension_numbers<[1], [1], [0], [0], [0, 0, 1, 0], [], []>} : vector<1x128xf32>, vector<128x128xf32>, vector<1x128xf32> -> vector<1x128xf32>
    %15 = arith.addf %12, %14 : vector<1x128xf32>
    %c0_14 = arith.constant 0 : index
    %c0_15 = arith.constant 0 : index
    %16 = vector.load %arg9[%c0_14, %c0_15] : memref<1x128xf32, #tpu.memory_space<vmem>>, vector<1x128xf32>
    tpu.vector_store %arg9[%c0_14, %c0_15], %15 {strides = array<i32>} : memref<1x128xf32, #tpu.memory_space<vmem>>, vector<1x128xf32>,
    %c1_i32 = arith.constant 1 : i32
    %17 = arith.cmpi eq, %arg1, %c1_i32 : i32
    %18 = arith.extui %17 : i1 to i32
    %c0_i32_16 = arith.constant 0 : i32
    %19 = arith.cmpi ne, %18, %c0_i32_16 : i32
    scf.if %19 {
      %c0_17 = arith.constant 0 : index
      %c0_18 = arith.constant 0 : index
      %20 = vector.load %arg9[%c0_17, %c0_18] : memref<1x128xf32, #tpu.memory_space<vmem>>, vector<1x128xf32>
      %c0_19 = arith.constant 0 : index
      %c0_20 = arith.constant 0 : index
      %21 = memref.load %arg6[%c0_19, %c0_20] : memref<1x1xf32, #tpu.memory_space<smem>>
      %22 = vector.broadcast %21 : f32 to vector<1x128xf32>
      %23 = arith.addf %20, %22 : vector<1x128xf32>
      %cst_21 = arith.constant 0.000000e+00 : f32
      %24 = vector.broadcast %cst_21 : f32 to vector<1x128xf32>
      %25 = arith.maximumf %23, %24 : vector<1x128xf32>
      %c0_22 = arith.constant 0 : index
      %c0_23 = arith.constant 0 : index
      %26 = vector.load %arg8[%c0_22, %c0_23] : memref<1x128xf32, #tpu.memory_space<vmem>>, vector<1x128xf32>
      tpu.vector_store %arg8[%c0_22, %c0_23], %25 {strides = array<i32>} : memref<1x128xf32, #tpu.memory_space<vmem>>, vector<1x128xf32>,
    } else {
    }
    return
  }
  func.func @transform_0(%arg0: i32, %arg1: i32) -> (i32, i32) {
    %c0_i32 = arith.constant 0 : i32
    %c0_i32_0 = arith.constant 0 : i32
    return %arg0, %c0_i32 : i32, i32
  }
  func.func @transform_1(%arg0: i32, %arg1: i32) -> (i32, i32) {
    %c0_i32 = arith.constant 0 : i32
    %c0_i32_0 = arith.constant 0 : i32
    return %c0_i32, %arg1 : i32, i32
  }
  func.func @transform_2(%arg0: i32, %arg1: i32) -> (i32, i32) {
    %c0_i32 = arith.constant 0 : i32
    %c0_i32_0 = arith.constant 0 : i32
    return %c0_i32, %arg1 : i32, i32
  }
  func.func @transform_3(%arg0: i32, %arg1: i32) -> (i32, i32) {
    %c0_i32 = arith.constant 0 : i32
    %c0_i32_0 = arith.constant 0 : i32
    return %c0_i32, %arg1 : i32, i32
  }
  func.func @transform_4(%arg0: i32, %arg1: i32) -> (i32, i32) {
    %c0_i32 = arith.constant 0 : i32
    %c0_i32_0 = arith.constant 0 : i32
    %c0_i32_1 = arith.constant 0 : i32
    return %c0_i32, %c0_i32_0 : i32, i32
  }
  func.func @transform_5(%arg0: i32, %arg1: i32) -> (i32, i32) {
    %c0_i32 = arith.constant 0 : i32
    return %arg0, %arg1 : i32, i32
  }
  func.func @transform_6(%arg0: i32, %arg1: i32) -> (i32, i32) {
    %c0_i32 = arith.constant 0 : i32
    %c0_i32_0 = arith.constant 0 : i32
    return %c0_i32, %arg0 : i32, i32
  }
}

</mosaic_0001>

<bundles_post_ra>
// kernel: tpu_custom_call.1
= control target key start
LH: loop header
LB: loop body
LE: loop exit
PB: predicated region body
PF: predicated region fallthrough
CT: control target
= control target key end

     0   :  { %s2010_s0 = inlined_call_operand.hbm [shape: bf16[256,128], index: 0, kind: input, shape index: {}]   ;;  %s2011_s1 = inlined_call_operand.hbm [shape: bf16[128,256], index: 1, kind: input, shape index: {}]   ;;  %s2012_s2 = inlined_call_operand.vmem [shape: f32[1,256], index: 2, kind: input, shape index: {}]   ;;  %s2013_s3 = inlined_call_operand.vmem [shape: f32[1,256], index: 3, kind: input, shape index: {}]   ;;  %s2014_s4 = inlined_call_operand.<no memory space> [shape: f32[1,1], index: 4, kind: input, shape index: {}]   ;;  %s2015_s5 = inlined_call_operand.hbm [shape: f32[256,256], index: 5, kind: output, shape index: {0}]   ;;  %s2016_s6 = inlined_call_operand.hbm [shape: f32[1,256], index: 6, kind: output, shape index: {1}]  }
   0x1   :  { %2042 = sst [smem:[#allocation27_spill]] %s2010_s0 }
   0x2   :  { %2043 = sst [smem:[#allocation28_spill]] %s2011_s1 }
   0x3   :  { %2044 = sst [smem:[#allocation29_spill]] %s2012_s2 }
   0x4   :  { %2045 = sst [smem:[#allocation30_spill]] %s2013_s3 }
   0x5   :  { %2046 = sst [smem:[#allocation31_spill]] %s2015_s5 }
   0x6   :  { %2047 = sst [smem:[#allocation32_spill]] %s2016_s6 }
   0x7   :  { %12 = sst [smem:[#allocation3]] %s2014_s4 }
   0x8   :  { %13 = vsyncpa [#allocation5], 0 }
   0x9   :  { %15 = vsyncpa [#allocation5 + $0x1], 0 }
   0xa   :  { %16 = vsyncpa [#allocation8], 0 }
   0xb   :  { %18 = vsyncpa [#allocation8 + $0x1], 0 }
   0xc   :  { %19 = vsyncpa [#allocation6], 0 }
   0xd   :  { %21 = vsyncpa [#allocation6 + $0x1], 0 }
   0xe   :  { %22 = vsyncpa [#allocation11], 0 }
   0xf   :  { %24 = vsyncpa [#allocation11 + $0x1], 0  ;;  %s1529_s23 = smov 0   ;;  %s1531_s24 = smov 0  }
  0x10   :  { %s1533_s25 = smov 0   ;;  %s1535_s26 = smov 0  }
  0x11   :  { %s1537_s27 = smov 0   ;;  %s1539_s28 = smov 0  }
  0x12   :  { %s1541_s4 = smov 0   ;;  %s1543_s29 = smov 0  }
  0x13   :  { %s1545_s30 = smov 0   ;;  %s1547_s7 = smov 0  }
  0x14   :  { %s1549_s8 = smov 0   ;;  %s1551_s9 = smov 0  }
  0x15   :  { %s1553_s10 = smov 0   ;;  %s1555_s11 = smov 0  }
  0x16 LB: > { %2048 = sst [smem:[#allocation16_spill]] %s1423_s23  ;;  %s906_s12 = sadd.s32 4294967295, %s1475_s11   ;;  %s1475_s11 = sphi %s1555_s11, %s30_s11   ;;  %s1471_s10 = sphi %s1553_s10, %s2103_s10   ;;  %s1467_s9 = sphi %s1551_s9, %s2113_s9   ;;  %s1463_s8 = sphi %s1549_s8, %s2101_s8   ;;  %s1459_s7 = sphi %s1547_s7, %s2112_s7   ;;  %s1455_s30 = sphi %s1545_s30, %s2111_s30   ;;  %s1451_s29 = sphi %s1543_s29, %s2110_s29   ;;  %s1447_s4 = sphi %s1541_s4, %s2109_s4   ;;  %s1443_s28 = sphi %s1539_s28, %s2108_s28   ;;  %s1439_s27 = sphi %s1537_s27, %s2107_s27   ;;  %s1435_s26 = sphi %s1535_s26, %s2106_s26   ;;  %s1431_s25 = sphi %s1533_s25, %s2105_s25   ;;  %s1427_s24 = sphi %s1531_s24, %s2104_s24   ;;  %s1423_s23 = sphi %s1529_s23, %s2100_s23  }
  0x17   : > { %2049 = sst [smem:[#allocation17_spill]] %s1427_s24  ;;  %s907_s13 = sadd.s32 4294967294, %s1475_s11  }
  0x18   : > { %2050 = sst [smem:[#allocation18_spill]] %s1447_s4  ;;  %p56_p0 = scmp.ne.s32.totalorder %s1455_s30, %s1451_s29 }
  0x19   : > { %2051 = sst [smem:[#allocation19_spill]] %s1463_s8  ;;  %p2017_p1 = scmp.eq.s32.totalorder %s1475_s11, 0 }
  0x1a   : > { %2052 = sst [smem:[#allocation20_spill]] %s1471_s10  ;;  %p62_p2 = scmp.ne.s32.totalorder %s1451_s29, %s1447_s4 }
  0x1b   : > { %p1608_p3 = scmp.eq.s32.totalorder %s906_s12, 0  ;;  %p1614_p4 = por %p2017_p1, %p56_p0 }
  0x1c   : > { %p186_p5 = scmp.ne.s32.totalorder %s1431_s25, %s1427_s24  ;;  %p187_p7 = scmp.eq.s32.totalorder %s906_s12, 3 }
  0x1d   : > { %p1622_p6 = por %p1608_p3, %p62_p2  ;;  %p192_p8 = scmp.ne.s32.totalorder %s1427_s24, %s1423_s23 }
  0x1e   : > { %p193_p9 = scmp.eq.s32.totalorder %s907_s13, 3  ;;  %p1628_p10 = por %p187_p7, %p186_p5 }
  0x1f   : > { %s2055_s18 = scalar_select %p1622_p6, 1, 0 }
  0x20   : > { %s2056_s19 = scalar_select %p1628_p10, 1, 0 }
  0x21   : > { %p1632_p11 = por %p187_p7, %p56_p0  ;;  %p1636_p12 = por %p193_p9, %p192_p8 }
  0x22   : > { %2057 = sst [smem:[#allocation21_spill]] %s2056_s19  ;;  %p1640_p13 = por %p193_p9, %p62_p2 }
  0x23   : > { %s2058_s20 = scalar_select %p1632_p11, 1, 0 }
  0x24   : > { %s2060_s21 = scalar_select %p1636_p12, 1, 0 }
  0x25   : > { %2059 = sst [smem:[#allocation22_spill]] %s2058_s20  ;;  %p2025_p1 = scmp.lt.s32.totalorder %s1475_s11, 4 }
  0x26   : > { %2061 = sst [smem:[#allocation23_spill]] %s2060_s21  ;;  %s242_s12 = sand.u32 1, %s1455_s30  }
  0x27   : > { %s2062_s22 = scalar_select %p1640_p13, 1, 0 }
  0x28   : > { %s945_s15 = sshll.u32 %s1471_s10, 10  ;;  %s910_s13 = sshll.u32 %s242_s12, 6 }
  0x29   : > { %2063 = sst [smem:[#allocation24_spill]] %s2062_s22  ;;  %s246_s6 = scalar_lea.vmem [#allocation4], %s910_s13 }
  0x2a   : > { %s2064_s0 = sld [smem:[#allocation27_spill]]  ;;  %s253_s20 = sshll.u32 %s246_s6, 4  ;;  %s1660_s20 = int_to_ptr.vmem [resolvable:$true] %s253_s20 }
  0x2b   : > { %p1656_p0 = pnand %p2025_p1, %p1614_p4  ;;  %s1662_s22 = scalar_lea.sflag [#allocation5], %s242_s12 }
  0x2d   : > { %p1235_p5 = pneg %p1656_p0 }
  0x30   : > { %s1650_s23 = scalar_lea.hbm %s2064_s0, %s945_s15  ;;  %s1238_s15 = scalar_lea.hbm %s2064_s0, 2048 }
  0x31   : > { %s1233_s4 = scalar_lea.hbm %s1650_s23, 1024  ;;  %p1239_p4 = scmp.lt.u32.totalorder %s1650_s23, %s2064_s0 }
  0x32   : > { %p1234_p2 = scmp.ne.s32.totalorder %s1650_s23, %s1233_s4  ;;  %p1240_p9 = scmp.lt.u32.totalorder %s1238_s15, %s1233_s4 }
  0x33   : > { %p1242_p13 = scmp.lt.u32.totalorder %s1233_s4, %s1650_s23 }
  0x34   : > { %p1236_p7 = pnand %p1235_p5, %p1234_p2  ;;  %p1241_p1 = por %p1240_p9, %p1239_p4 }
  0x36   : > { %p1237_p8 = pneg %p1236_p7  ;;  %p1243_p12 = por %p1242_p13, %p1241_p1 }
  0x38   : > { %p1244_p11 = pnand %p1243_p12, %p1237_p8 }
  0x3a   : > { %1247 = shalt.err (!%p1244_p11)
}
  0x3b   : > { %s1248_s12 = scalar_lea.vmem %s1660_s20, 1024  ;;  %s1477_s6 = smov [#allocation4]  }
  0x3c   : > { %p1249_p2 = scmp.ne.s32.totalorder %s1660_s20, %s1248_s12  ;;  %s1253_s14 = sshll.u32 %s1477_s6, 4  ;;  %s1254_s14 = int_to_ptr.vmem [resolvable:$false] %s1253_s14 }
  0x3d   : > { %s1255_s17 = scalar_lea.vmem %s1254_s14, 2048  ;;  %p1256_p6 = scmp.lt.s32.totalorder %s1660_s20, %s1254_s14 }
  0x3e   : > { %p1251_p7 = pnand %p1249_p2, %p1235_p5  ;;  %p1257_p4 = scmp.lt.s32.totalorder %s1255_s17, %s1248_s12 }
  0x40   : > { %p1252_p10 = pneg %p1251_p7  ;;  %p1258_p9 = por %p1257_p4, %p1256_p6 }
  0x42   : > { %p1259_p1 = pnand %p1258_p9, %p1252_p10 }
  0x44   : > { %1262 = shalt.err (!%p1259_p1)
}
  0x45   : > { %s2029_s4 = smov 64   ;;  %s2030_s15 = smov 4  }
  0x46   : > { %1082 = dma.hbm_to_vmem [thread:$0]  (!%p1656_p0), %s1650_s23, 1024, %s1660_s20, %s1662_s22, %s2029_s4, %s2029_s4, %s2030_s15  }
  0x47   : > { %p915_p6 = scmp.ge.s32.totalorder %s1475_s11, 1  ;;  %p293_p10 = scmp.lt.s32.totalorder %s1475_s11, 5 }
  0x48   : > { %s39_s12 = sadd.s32 1, %s1467_s9  ;;  %s75_s6 = sadd.s32 1, %s1443_s28 }
  0x49   : > { %p1695_p11 = pnand %p915_p6, %p293_p10  ;;  %p40_p12 = scmp.ge.s32.totalorder %s39_s12, 2 }
  0x4a   : > { %p82_p13 = scmp.ne.s32.totalorder %s1443_s28, %s1439_s27  ;;  %p88_p5 = scmp.ne.s32.totalorder %s1439_s27, %s1435_s26 }
  0x4b   : > { %s2115_s12 = smov (%p40_p12, %s39_s12), 0  ;;  %s2068_s23 = sadd.s32 1, %s1471_s10 }
  0x4c   : > { %2067 = sst [smem:[#allocation25_spill]] %s2115_s12  ;;  %s2117_s23 = smov (!%p40_p12, %s2068_s23), %s1471_s10 }
  0x4d   : > { %s72_s20 = ssub.s32 %s1467_s9, %s2115_s12  ;;  %p2069_p0 = scmp.eq.s32.totalorder %s1475_s11, 0 }
  0x4e   : > { %p44_p2 = scmp.ge.s32.totalorder %s2117_s23, 2  ;;  %p73_p7 = scmp.eq.s32.totalorder %s72_s20, 0 }
  0x4f   : > { %p1714_p8 = por %p82_p13, %p2069_p0  ;;  %p1720_p4 = por %p88_p5, %p1608_p3 }
  0x50   : > { %s176_s22 = sadd.s32 1, %s1431_s25  ;;  %s2119_s23 = smov (%p44_p2, %s2117_s23), 0 }
  0x51   : > { %s2071_s26 = scalar_select %p1720_p4, 1, 0 }
  0x52   : > { %2072 = sst [smem:[#allocation26_spill]] %s2119_s23  ;;  %s46_s17 = ssub.s32 %s1471_s10, %s2119_s23 }
  0x53   : > { %s1728_s14 = scalar_select %p73_p7, %s1443_s28, %s75_s6  }
  0x54   : > { %s263_s4 = sand.u32 1, %s1443_s28   ;;  %p47_p9 = scmp.eq.s32.totalorder %s46_s17, 0 }
  0x55   : > { %s173_s15 = sor.u32 %s72_s20, %s46_s17  ;;  %s2073_s0 = sadd.s32 1, %s1455_s30 }
  0x56   : > { %p174_p1 = scmp.eq.s32.totalorder %s173_s15, 0  ;;  %s913_s5 = sshll.u32 %s263_s4, 6 }
  0x57   : > { %s1736_s12 = scalar_select %p47_p9, %s1455_s30, %s2073_s0  }
  0x58   : > { %s1739_s16 = scalar_select %p174_p1, %s1431_s25, %s176_s22  }
  0x59   : > { %s914_s19 = sshll.u32 %s1467_s9, 6  ;;  %s2074_s1 = sld [smem:[#allocation28_spill]] }
  0x5a   : > { %s267_s6 = scalar_lea.vmem [#allocation7], %s913_s5  ;;  %p2075_p3 = scmp.lt.s32.totalorder %s1475_s11, 4 }
  0x5b   : > { %s273_s23 = sshll.u32 %s267_s6, 4  ;;  %s1757_s15 = scalar_lea.sflag [#allocation8], %s263_s4  ;;  %s1755_s23 = int_to_ptr.vmem [resolvable:$true] %s273_s23 }
  0x5c   : > { %p1751_p6 = pnand %p2075_p3, %p1714_p8 }
  0x5e   : > { %p1265_p12 = pneg %p1751_p6 }
  0x5f   : > { %s1745_s24 = scalar_lea.hbm %s2074_s1, %s914_s19  ;;  %s1268_s19 = scalar_lea.hbm %s2074_s1, 2048 }
  0x60   : > { %s1263_s2 = scalar_lea.hbm %s1745_s24, 1024  ;;  %p1269_p0 = scmp.lt.u32.totalorder %s1745_s24, %s2074_s1 }
  0x61   : > { %p1264_p10 = scmp.ne.s32.totalorder %s1745_s24, %s1263_s2  ;;  %p1270_p8 = scmp.lt.u32.totalorder %s1268_s19, %s1263_s2 }
  0x62   : > { %p1272_p7 = scmp.lt.u32.totalorder %s1263_s2, %s1745_s24 }
  0x63   : > { %p1266_p13 = pnand %p1265_p12, %p1264_p10  ;;  %p1271_p2 = por %p1270_p8, %p1269_p0 }
  0x65   : > { %p1267_p5 = pneg %p1266_p13  ;;  %p1273_p9 = por %p1272_p7, %p1271_p2 }
  0x67   : > { %p1274_p1 = pnand %p1273_p9, %p1267_p5 }
  0x69   : > { %1277 = shalt.err (!%p1274_p1)
}
  0x6a   : > { %s1278_s4 = scalar_lea.vmem %s1755_s23, 1024  ;;  %s1480_s22 = smov [#allocation7]  }
  0x6b   : > { %p1279_p3 = scmp.ne.s32.totalorder %s1755_s23, %s1278_s4  ;;  %s1283_s17 = sshll.u32 %s1480_s22, 4  ;;  %s1284_s17 = int_to_ptr.vmem [resolvable:$false] %s1283_s17 }
  0x6c   : > { %s1285_s6 = scalar_lea.vmem %s1284_s17, 2048  ;;  %p1286_p4 = scmp.lt.s32.totalorder %s1755_s23, %s1284_s17 }
  0x6d   : > { %p1281_p10 = pnand %p1279_p3, %p1265_p12  ;;  %p1287_p0 = scmp.lt.s32.totalorder %s1285_s6, %s1278_s4 }
  0x6f   : > { %p1282_p13 = pneg %p1281_p10  ;;  %p1288_p8 = por %p1287_p0, %p1286_p4 }
  0x71   : > { %p1289_p2 = pnand %p1288_p8, %p1282_p13 }
  0x73   : > { %1292 = shalt.err (!%p1289_p2)
}
  0x74   : > { %s1481_s2 = smov 128   ;;  %s2077_s5 = smov 4  }
  0x75   : > { %s2078_s8 = smov 64   ;;  %297 = sbr.rel (%p1695_p11) target bundleno = 756 (0x2f4), region = 40 }
  0x76   : > { %1085 = dma.hbm_to_vmem [thread:$0]  (!%p1751_p6), %s1745_s24, 1024, %s1755_s23, %s1757_s15, %s1481_s2, %s2078_s8, %s2077_s5  }
  0x77   : > { %s1790_s19 = sand.u32 (!%p1695_p11), 1, %s1451_s29   ;;  %p2079_p4 = scmp.ne.s32.totalorder (!%p1695_p11), %s2055_s18, 0 }
  0x78   : > { %s916_s20 = sshll.u32 (!%p1695_p11), %s1790_s19, 6  ;;  %s300_s21 = scalar_lea.sflag (!%p1695_p11), [#allocation5], %s1790_s19 }
  0x79   : > { %s1794_s4 = scalar_lea.vmem (!%p1695_p11), [#allocation4], %s916_s20 }
  0x7c   : > { %1406 = dma.done.wait (%p2079_p4), %s300_s21, 1024  }
  0x7d   : > { %1408 = vsyncadd (%p2079_p4), %s300_s21, 4294966272  ;;  %s308_s24 = sand.u32 1, %s1439_s27   ;;  %p2080_p11 = scmp.ne.s32.totalorder %s2071_s26, 0 }
  0x7e   : > { %s917_s13 = sshll.u32 %s308_s24, 6  ;;  %s309_s23 = scalar_lea.sflag [#allocation8], %s308_s24 }
  0x7f   : > { %s312_s0 = scalar_lea.vmem [#allocation7], %s917_s13 }
  0x80   : > { %1410 = dma.done.wait (%p2080_p11), %s309_s23, 1024  }
  0x81   : > { %1412 = vsyncadd (%p2080_p11), %s309_s23, 4294966272  ;;  %p357_p6 = scmp.lt.s32.totalorder %s1459_s7, 1  ;;  %s2081_s3 = sld [smem:[#allocation30_spill]]  ;;  %v1217_v0 = vld [vmem:[%s312_s0] sm:$0xff]   ;;  %v1218_v1 = vld [vmem:[%s312_s0 + $0x8] sm:$0xff]  }
  0x82   : > { %980 = vmatprep.subr.bf16.mxu0 %v1217_v0  ;;  %v1219_v2 = vld [vmem:[%s312_s0 + $0x10] sm:$0xff]   ;;  %v1220_v3 = vld [vmem:[%s312_s0 + $0x18] sm:$0xff]   ;;  %v1225_v4 = vld [vmem:[%s1794_s4] sm:$0xff]   ;;  %s2082_s26 = sld [smem:[#allocation17_spill]]  ;;  %s2083_s5 = sld [smem:[#allocation29_spill]] }
  0x83   : > { %s1807_s15 = scalar_select %p357_p6, %s1459_s7, 1  ;;  %981 = vmatpush3.bf16.msra.mxu0 %v1217_v0  ;;  %996 = vmatprep.mubr.bf16.mxu0 %v1225_v4  ;;  %v1221_v5 = vld [vmem:[%s312_s0 + $0x20] sm:$0xff]   ;;  %v1222_v6 = vld [vmem:[%s312_s0 + $0x28] sm:$0xff]   ;;  %v1223_v7 = vld [vmem:[%s312_s0 + $0x30] sm:$0xff]  }
  0x84   : > { %982 = vmatprep.subr.bf16.mxu0 %v1218_v1  ;;  %v1224_v8 = vld [vmem:[%s312_s0 + $0x38] sm:$0xff]   ;;  %v1226_v9 = vld [vmem:[%s1794_s4 + $0x8] sm:$0xff]   ;;  %v1227_v10 = vld [vmem:[%s1794_s4 + $0x10] sm:$0xff]   ;;  %s355_s24 = scalar_lea.vmem [#allocation10], %s1790_s19  ;;  %p936_p12 = scmp.ne.s32.totalorder %s1459_s7, 0 }
  0x85   : > { %v1228_v11 = vld [vmem:[%s1794_s4 + $0x18] sm:$0xff]   ;;  %v1229_v12 = vld [vmem:[%s1794_s4 + $0x20] sm:$0xff]   ;;  %v1230_v13 = vld [vmem:[%s1794_s4 + $0x28] sm:$0xff]  }
  0x86   : > { %v1231_v14 = vld [vmem:[%s1794_s4 + $0x30] sm:$0xff]   ;;  %v1232_v15 = vld [vmem:[%s1794_s4 + $0x38] sm:$0xff]  }
  0x87   : > { %s362_s17 = scalar_lea.vmem %s2081_s3, %s1807_s15  ;;  %983 = vmatpush3.bf16.msra.mxu0 %v1218_v1  ;;  %v1482_v1 = vmov (!%p936_p12), 0.0  }
  0x88   : > { %984 = vmatprep.subr.bf16.mxu0 %v1219_v2  ;;  %s359_s8 = scalar_lea.vmem %s2083_s5, %s1807_s15  ;;  %s347_s20 = sand.u32 1, %s2082_s26   ;;  %633 = vst [vmem:[#allocation2] sm:$0x1] (!%p936_p12), %v1482_v1 }
  0x89   : > { %v919_v16 = vld [vmem:[%s359_s8] ss:$0 sm:$0xff]  ;;  %s918_s21 = sshll.u32 %s347_s20, 7 }
  0x8a   : > { %s1838_s4 = scalar_lea.vmem [#allocation9], %s918_s21 }
  0x8b   : > { %985 = vmatpush3.bf16.msra.mxu0 %v1219_v2 }
  0x8c   : > { %986 = vmatprep.subr.bf16.mxu0 %v1220_v3 }
  0x8f   : > { %987 = vmatpush3.bf16.msra.mxu0 %v1220_v3 }
  0x90   : > { %988 = vmatprep.subr.bf16.mxu0 %v1221_v5 }
  0x93   : > { %989 = vmatpush3.bf16.msra.mxu0 %v1221_v5 }
  0x94   : > { %990 = vmatprep.subr.bf16.mxu0 %v1222_v6 }
  0x97   : > { %991 = vmatpush3.bf16.msra.mxu0 %v1222_v6 }
  0x98   : > { %992 = vmatprep.subr.bf16.mxu0 %v1223_v7 }
  0x9b   : > { %993 = vmatpush3.bf16.msra.mxu0 %v1223_v7 }
  0x9c   : > { %994 = vmatprep.subr.bf16.mxu0 %v1224_v8 }
  0x9f   : > { %995 = vmatpush3.bf16.msra.mxu0 %v1224_v8 }
  0xa2   : > { %997 = vmatmul.mubr.bf16.vlgmr.msra.gmra.mrb[0].mxu0 %v1226_v9 }
  0xa3   : > { %1000 = vmatprep.mubr.bf16.mxu0 %v1227_v10 }
  0xaa   : > { %1001 = vmatmul.mubr.bf16.gmra.mrb[4].mxu0 %v1228_v11 }
  0xab   : > { %1004 = vmatprep.mubr.bf16.mxu0 %v1229_v12 }
  0xb2   : > { %1005 = vmatmul.mubr.bf16.gmra.mrb[8].mxu0 %v1230_v13 }
  0xb3   : > { %1008 = vmatprep.mubr.bf16.mxu0 %v1231_v14 }
  0xba   : > { %1009 = vmatmul.mubr.bf16.gmra.mrb[12].mxu0 %v1232_v15 }
 0x175   : > { %v998_v17 = vpop.f32.mrb[0].mxu0 }
 0x176   : > { %v1828_v18 = vadd.f32 %v998_v17, %v919_v16  ;;  %v534_v19 = vpop.f32.mrb[1].mxu0 }
 0x177   : > { %v1830_v20 = vadd.f32 %v919_v16, %v534_v19  ;;  %v999_v21 = vpop.f32.mrb[2].mxu0 }
 0x178   : > { %v599_v22 = vmax.f32 %v1828_v18, 0.0  ;;  %v1833_v23 = vadd.f32 %v999_v21, %v919_v16  ;;  %v537_v24 = vpop.f32.mrb[3].mxu0 }
 0x179   : > { %v597_v25 = vmax.f32 %v1830_v20, 0.0  ;;  %v1836_v26 = vadd.f32 %v919_v16, %v537_v24 }
 0x17a   : > { %615 = vst [vmem:[%s1838_s4 + $0x10] sm:$0xff] %v599_v22  ;;  %v600_v27 = vmax.f32 %v1833_v23, 0.0 }
 0x17b   : > { %613 = vst [vmem:[%s1838_s4] sm:$0xff] %v597_v25  ;;  %v598_v28 = vmax.f32 %v1836_v26, 0.0 }
 0x17c   : > { %616 = vst [vmem:[%s1838_s4 + $0x18] sm:$0xff] %v600_v27 }
 0x17d   : > { %614 = vst [vmem:[%s1838_s4 + $0x8] sm:$0xff] %v598_v28  ;;  %v1002_v29 = vpop.f32.mrb[4].mxu0 }
 0x17e   : > { %v1852_v30 = vadd.f32 %v1002_v29, %v919_v16  ;;  %v550_v31 = vpop.f32.mrb[5].mxu0 }
 0x17f   : > { %v1854_v32 = vadd.f32 %v919_v16, %v550_v31  ;;  %v1003_v33 = vpop.f32.mrb[6].mxu0 }
 0x180   : > { %v603_v34 = vmax.f32 %v1852_v30, 0.0  ;;  %v1857_v35 = vadd.f32 %v1003_v33, %v919_v16  ;;  %v553_v36 = vpop.f32.mrb[7].mxu0 }
 0x181   : > { %v601_v37 = vmax.f32 %v1854_v32, 0.0  ;;  %v554_v38 = vadd.f32 %v919_v16, %v553_v36 }
 0x182   : > { %619 = vst [vmem:[%s1838_s4 + $0x30] sm:$0xff] %v603_v34  ;;  %v604_v39 = vmax.f32 %v1857_v35, 0.0 }
 0x183   : > { %617 = vst [vmem:[%s1838_s4 + $0x20] sm:$0xff] %v601_v37  ;;  %v602_v40 = vmax.f32 %v554_v38, 0.0 }
 0x184   : > { %620 = vst [vmem:[%s1838_s4 + $0x38] sm:$0xff] %v604_v39 }
 0x185   : > { %618 = vst [vmem:[%s1838_s4 + $0x28] sm:$0xff] %v602_v40  ;;  %v1006_v41 = vpop.f32.mrb[8].mxu0 }
 0x186   : > { %v575_v42 = vadd.f32 %v1006_v41, %v919_v16  ;;  %v566_v43 = vpop.f32.mrb[9].mxu0 }
 0x187   : > { %v567_v44 = vadd.f32 %v919_v16, %v566_v43  ;;  %v1007_v45 = vpop.f32.mrb[10].mxu0 }
 0x188   : > { %v607_v46 = vmax.f32 %v575_v42, 0.0  ;;  %v578_v47 = vadd.f32 %v1007_v45, %v919_v16  ;;  %v569_v48 = vpop.f32.mrb[11].mxu0 }
 0x189   : > { %v605_v49 = vmax.f32 %v567_v44, 0.0  ;;  %v570_v50 = vadd.f32 %v919_v16, %v569_v48 }
 0x18a   : > { %623 = vst [vmem:[%s1838_s4 + $0x50] sm:$0xff] %v607_v46  ;;  %v608_v51 = vmax.f32 %v578_v47, 0.0 }
 0x18b   : > { %621 = vst [vmem:[%s1838_s4 + $0x40] sm:$0xff] %v605_v49  ;;  %v606_v52 = vmax.f32 %v570_v50, 0.0 }
 0x18c   : > { %624 = vst [vmem:[%s1838_s4 + $0x58] sm:$0xff] %v608_v51 }
 0x18d   : > { %622 = vst [vmem:[%s1838_s4 + $0x48] sm:$0xff] %v606_v52  ;;  %v1010_v53 = vpop.f32.mrb[12].mxu0 }
 0x18e   : > { %v591_v54 = vadd.f32 %v1010_v53, %v919_v16  ;;  %v582_v55 = vpop.f32.mrb[13].mxu0 }
 0x18f   : > { %v583_v56 = vadd.f32 %v919_v16, %v582_v55  ;;  %v1011_v57 = vpop.f32.mrb[14].mxu0  ;;  %632 = sbr.rel (%p936_p12) target bundleno = 406 (0x196), region = 52 }
 0x190   : > { %v611_v58 = vmax.f32 %v591_v54, 0.0  ;;  %v594_v59 = vadd.f32 %v1011_v57, %v919_v16  ;;  %v585_v60 = vpop.f32.mrb[15].mxu0 }
 0x191   : > { %v609_v61 = vmax.f32 %v583_v56, 0.0  ;;  %v586_v62 = vadd.f32 %v919_v16, %v585_v60 }
 0x192   : > { %627 = vst [vmem:[%s1838_s4 + $0x70] sm:$0xff] %v611_v58  ;;  %v612_v63 = vmax.f32 %v594_v59, 0.0 }
 0x193   : > { %625 = vst [vmem:[%s1838_s4 + $0x60] sm:$0xff] %v609_v61  ;;  %v610_v0 = vmax.f32 %v586_v62, 0.0 }
 0x194   : > { %628 = vst [vmem:[%s1838_s4 + $0x78] sm:$0xff] %v612_v63 }
 0x195   : > { %626 = vst [vmem:[%s1838_s4 + $0x68] sm:$0xff] %v610_v0 }
 0x196 PF: > { %v1048_v2 = vpack.c.bf16 %v598_v28, %v597_v25  ;;  %v1483_v3 = vmov 0.0|0.0   ;;  %vm1484_vm0 = vmmov 0   ;;  %v1485_v4 = vmov 0.0   ;;  %v635_v12 = vld [vmem:[%s362_s17] sm:$0x1]  ;;  %p937_p5 = scmp.ne.s32.totalorder %s1459_s7, 1 }
 0x197   : > { %1047 = vmatprep.subr.bf16.mxu1 %v1483_v3  ;;  %1044 = vmatprep.mubr.msk.f32.mxu1 %vm1484_vm0, %v1485_v4  ;;  %v1051_v5 = vpack.c.bf16 %v600_v27, %v599_v22  ;;  %v1054_v6 = vpack.c.bf16 %v602_v40, %v601_v37  ;;  %v1057_v7 = vpack.c.bf16 %v604_v39, %v603_v34  ;;  %v634_v13 = vld [vmem:[#allocation2] sm:$0x1]  ;;  %s713_s0 = sld [smem:[#allocation3]] (!%p937_p5) }
 0x198   : > { %1049 = vmatpush3.bf16.xpose.msra.mxu1 %v1048_v2  ;;  %v1060_v8 = vpack.c.bf16 %v606_v52, %v605_v49  ;;  %v1063_v9 = vpack.c.bf16 %v608_v51, %v607_v46  ;;  %v1066_v10 = vpack.c.bf16 %v610_v0, %v609_v61  ;;  %v1069_v11 = vpack.c.bf16 %v612_v63, %v611_v58 }
 0x199   : > { %1050 = vmatprep.subr.bf16.mxu1 %v1483_v3 }
 0x19d   : > { %v714_v18 = vstv (!%p937_p5), %s713_s0 }
 0x1a0   : > { %1052 = vmatpush3.bf16.xpose.msra.mxu1 %v1051_v5 }
 0x1a1   : > { %1053 = vmatprep.subr.bf16.mxu1 %v1483_v3 }
 0x1a8   : > { %1055 = vmatpush3.bf16.xpose.msra.mxu1 %v1054_v6 }
 0x1a9   : > { %1056 = vmatprep.subr.bf16.mxu1 %v1483_v3 }
 0x1b0   : > { %1058 = vmatpush3.bf16.xpose.msra.mxu1 %v1057_v7 }
 0x1b1   : > { %1059 = vmatprep.subr.bf16.mxu1 %v1483_v3 }
 0x1b8   : > { %1061 = vmatpush3.bf16.xpose.msra.mxu1 %v1060_v8 }
 0x1b9   : > { %1062 = vmatprep.subr.bf16.mxu1 %v1483_v3 }
 0x1c0   : > { %1064 = vmatpush3.bf16.xpose.msra.mxu1 %v1063_v9 }
 0x1c1   : > { %1065 = vmatprep.subr.bf16.mxu1 %v1483_v3 }
 0x1c8   : > { %1067 = vmatpush3.bf16.xpose.msra.mxu1 %v1066_v10 }
 0x1c9   : > { %1068 = vmatprep.subr.bf16.mxu1 %v1483_v3 }
 0x1d0   : > { %1070 = vmatpush3.bf16.xpose.msra.mxu1 %v1069_v11 }
 0x1d7   : > { %1045 = vmatmul.mubr.f32.vlgmr.msra.gmra.mrb[0].mxu1 %v635_v12 }
 0x2a7   : > { %711 = sbr.rel (%p937_p5) target bundleno = 698 (0x2ba), region = 56 }
 0x2aa   : > { %v702_v14 = vpop.f32.mrb[0].mxu1 }
 0x2ab   : > { %v706_v15 = vadd.f32 %v702_v14, %v634_v13  ;;  %v1046_v16 = vpop.f32.mrb[1].mxu1 }
 0x2ad   : > { %707 = vst [vmem:[#allocation2] sm:$0x1] %v706_v15 }
 0x2b4   : > { %v712_v17 = vld [vmem:[#allocation2] sm:$0x1] }
 0x2b5   : > { %v715_v19 = vadd.f32 %v714_v18, %v712_v17 }
 0x2b7   : > { %v716_v20 = vmax.f32 %v715_v19, 0.0 }
 0x2b9   : > { %717 = vst [vmem:[%s355_s24] sm:$0x1] %v716_v20 }
 0x2ba PF: > { %s2085_s15 = sld [smem:[#allocation19_spill]]  ;;  %s2087_s22 = sld [smem:[#allocation21_spill]] }
 0x2bb   : > { %s738_s6 = sshll.u32 %s1838_s4, 4  ;;  %s2088_s21 = sld [smem:[#allocation31_spill]]  ;;  %s1896_s6 = int_to_ptr.vmem [resolvable:$true] %s738_s6 }
 0x2bc   : > { %s1905_s23 = scalar_lea.sflag [#allocation6], %s347_s20  ;;  %s1293_s0 = scalar_lea.vmem %s1896_s6, 2048 }
 0x2bd   : > { %p1294_p7 = scmp.ne.s32.totalorder %s1896_s6, %s1293_s0 }
 0x2c0   : > { %s946_s17 = sshll.u32 %s2085_s15, 5  ;;  %p2089_p9 = scmp.ne.s32.totalorder %s2087_s22, 0 }
 0x2c1   : > { %s735_s26 = sadd.s32 %s1459_s7, %s946_s17  ;;  %s1486_s7 = smov [#allocation9]  }
 0x2c2   : > { %s941_s2 = sshll.u32 %s735_s26, 7  ;;  %p1295_p1 = pnand %p1294_p7, %p2089_p9 }
 0x2c3   : > { %s1901_s13 = scalar_lea.hbm %s2088_s21, %s941_s2  ;;  %s1297_s4 = sshll.u32 %s1486_s7, 4  ;;  %s1298_s4 = int_to_ptr.vmem [resolvable:$false] %s1297_s4 }
 0x2c4   : > { %p1296_p3 = pneg %p1295_p1  ;;  %s1299_s17 = scalar_lea.vmem %s1298_s4, 4096 }
 0x2c5   : > { %p1300_p10 = scmp.lt.s32.totalorder %s1896_s6, %s1298_s4  ;;  %p1301_p13 = scmp.lt.s32.totalorder %s1299_s17, %s1293_s0 }
 0x2c7   : > { %p1302_p0 = por %p1301_p13, %p1300_p10 }
 0x2c9   : > { %p1303_p8 = pnand %p1302_p0, %p1296_p3 }
 0x2cb   : > { %1306 = shalt.err (!%p1303_p8)
}
 0x2cc   : > { %s1307_s20 = scalar_lea.hbm %s1901_s13, 2048  ;;  %s1311_s2 = scalar_lea.hbm %s2088_s21, 8192 }
 0x2cd   : > { %p1308_p2 = scmp.ne.s32.totalorder %s1901_s13, %s1307_s20  ;;  %p1312_p6 = scmp.lt.u32.totalorder %s1901_s13, %s2088_s21 }
 0x2ce   : > { %p1313_p12 = scmp.lt.u32.totalorder %s1311_s2, %s1307_s20  ;;  %p1315_p7 = scmp.lt.u32.totalorder %s1307_s20, %s1901_s13 }
 0x2cf   : > { %p1309_p4 = pnand %p1308_p2, %p2089_p9 }
 0x2d0   : > { %p1314_p5 = por %p1313_p12, %p1312_p6 }
 0x2d1   : > { %p1310_p11 = pneg %p1309_p4 }
 0x2d2   : > { %p1316_p1 = por %p1315_p7, %p1314_p5 }
 0x2d4   : > { %p1317_p3 = pnand %p1316_p1, %p1310_p11 }
 0x2d6   : > { %1320 = shalt.err (!%p1317_p3)
}
 0x2d7   : > { %s1487_s0 = smov 128   ;;  %s2090_s7 = sld [smem:[#allocation22_spill]] }
 0x2d8   : > { %s1488_s4 = smov 256   ;;  %s1489_s17 = smov 8  }
 0x2d9   : > { %1075 = dma.vmem_to_hbm [thread:$0]  (%p2089_p9), %s1896_s6, 2048, %s1901_s13, %s1905_s23, %s1487_s0, %s1488_s4, %s1489_s17  }
 0x2da   : > { %s942_s18 = sshll.u32 %s2085_s15, 4  ;;  %s2091_s20 = sld [smem:[#allocation32_spill]] }
 0x2db   : > { %s754_s8 = sshll.u32 %s355_s24, 4  ;;  %s724_s1 = scalar_lea.sflag [#allocation11], %s1790_s19  ;;  %s755_s8 = int_to_ptr.vmem [resolvable:$true] %s754_s8 }
 0x2dc   : > { %s1321_s3 = scalar_lea.vmem %s755_s8, 16  ;;  %s1490_s21 = smov [#allocation10]  }
 0x2dd   : > { %p1322_p10 = scmp.ne.s32.totalorder %s755_s8, %s1321_s3  ;;  %p2092_p13 = scmp.ne.s32.totalorder %s2090_s7, 0 }
 0x2de   : > { %s1325_s10 = sshll.u32 %s1490_s21, 4  ;;  %s1326_s10 = int_to_ptr.vmem [resolvable:$false] %s1325_s10 }
 0x2df   : > { %p1323_p0 = pnand %p1322_p10, %p2092_p13  ;;  %s1327_s22 = scalar_lea.vmem %s1326_s10, 32 }
 0x2e0   : > { %s1933_s5 = scalar_lea.hbm %s2091_s20, %s942_s18  ;;  %p1328_p9 = scmp.lt.s32.totalorder %s755_s8, %s1326_s10 }
 0x2e1   : > { %p1324_p8 = pneg %p1323_p0  ;;  %p1329_p2 = scmp.lt.s32.totalorder %s1327_s22, %s1321_s3 }
 0x2e3   : > { %p1330_p4 = por %p1329_p2, %p1328_p9 }
 0x2e5   : > { %p1331_p11 = pnand %p1330_p4, %p1324_p8 }
 0x2e7   : > { %1334 = shalt.err (!%p1331_p11)
}
 0x2e8   : > { %s1335_s19 = scalar_lea.hbm %s1933_s5, 16  ;;  %s1339_s6 = scalar_lea.hbm %s2091_s20, 32 }
 0x2e9   : > { %p1336_p6 = scmp.ne.s32.totalorder %s1933_s5, %s1335_s19  ;;  %p1340_p7 = scmp.lt.u32.totalorder %s1933_s5, %s2091_s20 }
 0x2ea   : > { %p1341_p1 = scmp.lt.u32.totalorder %s1339_s6, %s1335_s19  ;;  %p1343_p10 = scmp.lt.u32.totalorder %s1335_s19, %s1933_s5 }
 0x2eb   : > { %p1337_p12 = pnand %p1336_p6, %p2092_p13 }
 0x2ec   : > { %p1342_p3 = por %p1341_p1, %p1340_p7 }
 0x2ed   : > { %p1338_p5 = pneg %p1337_p12 }
 0x2ee   : > { %p1344_p0 = por %p1343_p10, %p1342_p3 }
 0x2f0   : > { %p1345_p8 = pnand %p1344_p0, %p1338_p5 }
 0x2f2   : > { %1348 = shalt.err (!%p1345_p8)
}
 0x2f3   : > { %1076 = dma.vmem_to_hbm [thread:$0]  (%p2092_p13), %s755_s8, 16, %s1933_s5, %s724_s1  }
 0x2f4 PF: > { %s2093_s3 = sld [smem:[#allocation16_spill]]  ;;  %s2094_s13 = sld [smem:[#allocation23_spill]] }
 0x2f5   : > { %p1094_p9 = scmp.ge.s32.totalorder %s1475_s11, 2 }
 0x2fa   : > { %s766_s23 = sand.u32 1, %s2093_s3   ;;  %p2095_p2 = scmp.ne.s32.totalorder %s2094_s13, 0 }
 0x2fb   : > { %s767_s0 = scalar_lea.sflag [#allocation6], %s766_s23 }
 0x2fc   : > { %p1087_p4 = pnand %p1094_p9, %p2095_p2 }
 0x2fe   : > { %1414 = dma.done.wait (!%p1087_p4), %s767_s0, 2048  }
 0x2ff   : > { %1416 = vsyncadd (!%p1087_p4), %s767_s0, 4294965248  ;;  %s2096_s4 = sld [smem:[#allocation18_spill]]  ;;  %s2097_s17 = sld [smem:[#allocation24_spill]] }
 0x305   : > { %s775_s18 = sand.u32 1, %s2096_s4   ;;  %p2098_p11 = scmp.ne.s32.totalorder %s2097_s17, 0 }
 0x306   : > { %s776_s26 = scalar_lea.sflag [#allocation11], %s775_s18 }
 0x307   : > { %p1090_p6 = pnand %p1094_p9, %p2098_p11 }
 0x309   : > { %1418 = dma.done.wait (!%p1090_p6), %s776_s26, 16  }
 0x30a   : > { %1420 = vsyncadd (!%p1090_p6), %s776_s26, 4294967280  ;;  %s30_s11 = sadd.s32 1, %s1475_s11   ;;  %s2100_s23 = sld [smem:[#allocation17_spill]] }
 0x30b   : > { %p1963_p13 = scmp.ge.s32.totalorder %s30_s11, 6   ;;  %s2101_s8 = sld [smem:[#allocation20_spill]] }
 0x30c   : > { %s2102_s2 = sld [smem:[#allocation25_spill]]  ;;  %s2103_s10 = sld [smem:[#allocation26_spill]] }
 0x30d   : > { %s2104_s24 = smov %s1431_s25  ;;  %s2105_s25 = smov %s1739_s16 }
 0x30e   : > { %s2106_s26 = smov %s1439_s27  ;;  %s2107_s27 = smov %s1443_s28 }
 0x30f   : > { %s2108_s28 = smov %s1728_s14  ;;  %s2109_s4 = smov %s1451_s29 }
 0x310   : > { %s2110_s29 = smov %s1455_s30  ;;  %s2111_s30 = smov %s1736_s12 }
 0x311   : > { %s2112_s7 = smov %s1467_s9  ;;  %29 = sbr.rel (!%p1963_p13) target bundleno = 22 (0x16), region = 129 }
 0x312   : > { %s2113_s9 = smov %s2102_s2 }
 0x318   :  { %780 = vsyncpa [#allocation5], 1 }
 0x319   :  { %782 = vsyncpa [#allocation5 + $0x1], 1 }
 0x31a   :  { %783 = vsyncpa [#allocation8], 1 }
 0x31b   :  { %785 = vsyncpa [#allocation8 + $0x1], 1 }
 0x31c   :  { %786 = vsyncpa [#allocation6], 1 }
 0x31d   :  { %788 = vsyncpa [#allocation6 + $0x1], 1 }
 0x31e   :  { %789 = vsyncpa [#allocation11], 1 }
 0x31f   :  { %791 = vsyncpa [#allocation11 + $0x1], 1 }

</bundles_post_ra>
